<compile_context>
chip_gen: v5e
topology: v5e:2x2
jax: 0.10.0
libtpu: 0.0.40
codegen_flags: <defaults>
</compile_context>

<pallas_src>
import jax
import jax.numpy as jnp
from jax.experimental import pallas as pl
from jax.experimental.pallas import tpu as pltpu


def _make_kernel(channels):
    """Builds the SEFPN kernel for a fixed list of per-input channel counts."""
    n = len(channels)
    offs = [0]
    for c in channels:
        offs.append(offs[-1] + c)

    def kernel(*refs):
        # refs layout:
        #   x_1..x_n      : (1, c_i, tm)   pixel tiles, channels on sublanes
        #   wg_1..wg_n    : (cin, c_i)     gate weight column blocks (out, in)
        #   bg            : (cin, 1)       gate bias
        #   wp_1..wp_n    : (cout, c_i)    point weight col blocks, BN scale folded
        #   shift         : (cout, 1)      fused BN shift
        #   o             : (1, cout, tm)  output tile (lane-dense)
        x_refs = refs[:n]
        wg_refs = refs[n:2 * n]
        bg_ref = refs[2 * n]
        wp_refs = refs[2 * n + 1:3 * n + 1]
        shift_ref = refs[3 * n + 1]
        o_ref = refs[3 * n + 2]

        xs = [r[0].astype(jnp.float32) for r in x_refs]          # (c_i, tm)

        # gate logits = Wg @ concat(x) + bg, computed blockwise (no concat)
        g = bg_ref[...]                                           # (cin, 1)
        for i in range(n):
            g = g + jnp.dot(wg_refs[i][...], xs[i],
                            preferred_element_type=jnp.float32)
        gate = jax.nn.sigmoid(g)                                  # (cin, tm)

        # y = (Wp * bn_scale) @ (gate * concat(x)) + shift, blockwise
        y = shift_ref[...]                                        # (cout, 1)
        for i in range(n):
            xo_i = gate[offs[i]:offs[i + 1], :] * xs[i]           # (c_i, tm)
            y = y + jnp.dot(wp_refs[i][...], xo_i,
                            preferred_element_type=jnp.float32)
        o_ref[0] = jnp.maximum(y, 0.0).astype(o_ref.dtype)

    return kernel


def _pick_tile(hw, cap=4096):
    """Largest 128-multiple divisor of hw (<= cap); fall back to full hw."""
    for cand in (4096, 2048, 1024, 512, 384, 256, 128):
        if cand <= cap and hw % cand == 0:
            return cand
    return hw  # full spatial extent (allowed as a full-dim block)


def sefpn_pallas(x_list, wg, bg, wp_scaled, shift, *, tm=None,
                 out_dtype=jnp.float32):
    """x_list: list of NCHW arrays. Returns (N, cout, H, W)."""
    n = len(x_list)
    N, _, H, W = x_list[0].shape
    HW = H * W
    channels = [int(x.shape[1]) for x in x_list]
    cin = sum(channels)
    cout = wp_scaled.shape[0]

    # NCHW -> (N, C, HW): contiguous, free reshape (no transpose, no concat).
    xs = [x.reshape(N, c, HW) for x, c in zip(x_list, channels)]

    if tm is None:
        tm = _pick_tile(HW)
    assert HW % tm == 0, "tile must divide H*W (picked automatically)"

    # Split weights into per-input column blocks (tiny, done once).
    offs = [0]
    for c in channels:
        offs.append(offs[-1] + c)
    wg_blocks = [wg[:, offs[i]:offs[i + 1]] for i in range(n)]
    wp_blocks = [wp_scaled[:, offs[i]:offs[i + 1]] for i in range(n)]

    grid = (N, HW // tm)

    x_specs = [pl.BlockSpec((1, c, tm), lambda b, j: (b, 0, j))
               for c in channels]
    wg_specs = [pl.BlockSpec((cin, c), lambda b, j: (0, 0)) for c in channels]
    bg_spec = pl.BlockSpec((cin, 1), lambda b, j: (0, 0))
    wp_specs = [pl.BlockSpec((cout, c), lambda b, j: (0, 0)) for c in channels]
    shift_spec = pl.BlockSpec((cout, 1), lambda b, j: (0, 0))
    out_spec = pl.BlockSpec((1, cout, tm), lambda b, j: (b, 0, j))

    y = pl.pallas_call(
        _make_kernel(channels),
        out_shape=jax.ShapeDtypeStruct((N, cout, HW), out_dtype),
        grid_spec=pltpu.PrefetchScalarGridSpec(
            num_scalar_prefetch=0,
            grid=grid,
            in_specs=x_specs + wg_specs + [bg_spec] + wp_specs + [shift_spec],
            out_specs=out_spec,
        ),
        compiler_params=pltpu.CompilerParams(
            dimension_semantics=("parallel", "parallel")),
    )(*xs, *wg_blocks, bg, *wp_blocks, shift)

    return y.reshape(N, cout, H, W)


def sefpn_forward(x_list, params):
    """x_list: list of NCHW arrays. Returns NCHW output."""
    return sefpn_pallas(
        x_list,
        params["wg"], params["bg"],
        params["wp_scaled"], params["shift"],
    )


def make_params(key, cin, cout):
    """Deterministic synthetic parameters (shapes match the PyTorch module)."""
    k1, k2, k3, k4, k5, k6, k7 = jax.random.split(key, 7)
    # conv1x1(cin, cin, bias=True): weight stored as (c_out, c_in) — torch layout.
    wg = jax.random.normal(k1, (cin, cin), jnp.float32) * 0.1
    bg = jax.random.normal(k2, (cin, 1), jnp.float32) * 0.1
    # conv1x1 of the bn_relu block (bias folded into BN), stored (c_out, c_in).
    wp = jax.random.normal(k3, (cout, cin), jnp.float32) * 0.1
    # BatchNorm (inference) params, fused into scale/shift.
    gamma = 1.0 + 0.1 * jax.random.normal(k4, (cout,), jnp.float32)
    beta = 0.1 * jax.random.normal(k5, (cout,), jnp.float32)
    mean = 0.1 * jax.random.normal(k6, (cout,), jnp.float32)
    var = jnp.abs(jax.random.normal(k7, (cout,), jnp.float32)) + 1.0
    eps = 1e-5
    scale = gamma / jnp.sqrt(var + eps)
    shift = (beta - mean * scale).reshape(cout, 1)
    wp_scaled = wp * scale[:, None]          # BN scale folded into the weight
    return {
        "wg": wg,
        "bg": bg,
        "wp_scaled": wp_scaled,
        "shift": shift,
        # unfolded copies kept only for the reference check
        "wp_raw": wp,
        "bn_scale": scale,
        "bn_shift": shift,
    }


def sefpn_reference(x_list, params):
    """Plain-JAX reference (uses the unfolded BN params) for correctness."""
    xi = jnp.concatenate(x_list, axis=1)          # (N, cin, H, W)
    N, cin, H, W = xi.shape
    xf = xi.reshape(N, cin, H * W)
    g = jnp.einsum('oi,nip->nop', params["wg"], xf) + params["bg"][None]
    gate = jax.nn.sigmoid(g)
    xo = gate * xf
    y = jnp.einsum('oi,nip->nop', params["wp_raw"], xo)
    y = y * params["bn_scale"][None, :, None] + params["bn_shift"][None]
    y = jnp.maximum(y, 0.0)
    cout = params["wp_raw"].shape[0]
    return y.reshape(N, cout, H, W)


if __name__ == "__main__":
    key = jax.random.PRNGKey(0)
    kx1, kx2, kx3, kp = jax.random.split(key, 4)

    # Small shapes consistent with the module: in_channels=[4, 4, 8], out=32.
    in_channels = [4, 4, 8]
    out_channels = 32
    N, H, W = 2, 16, 16
    cin = sum(in_channels)

    x_list = [
        jax.random.normal(kx1, (N, in_channels[0], H, W), jnp.float32),
        jax.random.normal(kx2, (N, in_channels[1], H, W), jnp.float32),
        jax.random.normal(kx3, (N, in_channels[2], H, W), jnp.float32),
    ]
    params = make_params(kp, cin, out_channels)

    out = sefpn_forward(x_list, params)
    out = jax.block_until_ready(out)

    ref = jax.block_until_ready(sefpn_reference(x_list, params))
    assert out.shape == (N, out_channels, H, W)
    assert jnp.allclose(out, ref, atol=1e-4, rtol=1e-4), "mismatch vs reference"

    print("KERNEL_OK")
</pallas_src>

<mosaic_0001>
module attributes {stable_mosaic.version = 11 : i64} {
  func.func @kernel(%arg0: i32, %arg1: i32, %arg2: memref<1x4x256xf32, #tpu.memory_space<vmem>>, %arg3: memref<1x4x256xf32, #tpu.memory_space<vmem>>, %arg4: memref<1x8x256xf32, #tpu.memory_space<vmem>>, %arg5: memref<16x4xf32, #tpu.memory_space<vmem>>, %arg6: memref<16x4xf32, #tpu.memory_space<vmem>>, %arg7: memref<16x8xf32, #tpu.memory_space<vmem>>, %arg8: memref<16x1xf32, #tpu.memory_space<vmem>>, %arg9: memref<32x4xf32, #tpu.memory_space<vmem>>, %arg10: memref<32x4xf32, #tpu.memory_space<vmem>>, %arg11: memref<32x8xf32, #tpu.memory_space<vmem>>, %arg12: memref<32x1xf32, #tpu.memory_space<vmem>>, %arg13: memref<1x32x256xf32, #tpu.memory_space<vmem>>) attributes {dimension_semantics = [#tpu.dimension_semantics<parallel>, #tpu.dimension_semantics<parallel>], iteration_bounds = array<i64: 2, 1>, scalar_prefetch = 0 : i64, scratch_operands = 0 : i64, tpu.core_type = #tpu.core_type<tc>, window_params = [{transform_indices = @transform_0, window_bounds = array<i64: 1, 4, 256>}, {transform_indices = @transform_1, window_bounds = array<i64: 1, 4, 256>}, {transform_indices = @transform_2, window_bounds = array<i64: 1, 8, 256>}, {pipeline_mode = #tpu.pipeline_mode<synchronous>, transform_indices = @transform_3, window_bounds = array<i64: 16, 4>}, {pipeline_mode = #tpu.pipeline_mode<synchronous>, transform_indices = @transform_4, window_bounds = array<i64: 16, 4>}, {pipeline_mode = #tpu.pipeline_mode<synchronous>, transform_indices = @transform_5, window_bounds = array<i64: 16, 8>}, {pipeline_mode = #tpu.pipeline_mode<synchronous>, transform_indices = @transform_6, window_bounds = array<i64: 16, 1>}, {pipeline_mode = #tpu.pipeline_mode<synchronous>, transform_indices = @transform_7, window_bounds = array<i64: 32, 4>}, {pipeline_mode = #tpu.pipeline_mode<synchronous>, transform_indices = @transform_8, window_bounds = array<i64: 32, 4>}, {pipeline_mode = #tpu.pipeline_mode<synchronous>, transform_indices = @transform_9, window_bounds = array<i64: 32, 8>}, {pipeline_mode = #tpu.pipeline_mode<synchronous>, transform_indices = @transform_10, window_bounds = array<i64: 32, 1>}, {transform_indices = @transform_11, window_bounds = array<i64: 1, 32, 256>}]} {
    %c0 = arith.constant 0 : index
    %c0_0 = arith.constant 0 : index
    %c0_1 = arith.constant 0 : index
    %0 = vector.load %arg2[%c0, %c0_0, %c0_1] : memref<1x4x256xf32, #tpu.memory_space<vmem>>, vector<1x4x256xf32>
    %1 = vector.shape_cast %0 : vector<1x4x256xf32> to vector<4x256xf32>
    %c0_2 = arith.constant 0 : index
    %c0_3 = arith.constant 0 : index
    %c0_4 = arith.constant 0 : index
    %2 = vector.load %arg3[%c0_2, %c0_3, %c0_4] : memref<1x4x256xf32, #tpu.memory_space<vmem>>, vector<1x4x256xf32>
    %3 = vector.shape_cast %2 : vector<1x4x256xf32> to vector<4x256xf32>
    %c0_5 = arith.constant 0 : index
    %c0_6 = arith.constant 0 : index
    %c0_7 = arith.constant 0 : index
    %4 = vector.load %arg4[%c0_5, %c0_6, %c0_7] : memref<1x8x256xf32, #tpu.memory_space<vmem>>, vector<1x8x256xf32>
    %5 = vector.shape_cast %4 : vector<1x8x256xf32> to vector<8x256xf32>
    %c0_8 = arith.constant 0 : index
    %c0_9 = arith.constant 0 : index
    %6 = vector.load %arg8[%c0_8, %c0_9] : memref<16x1xf32, #tpu.memory_space<vmem>>, vector<16x1xf32>
    %c0_10 = arith.constant 0 : index
    %c0_11 = arith.constant 0 : index
    %7 = vector.load %arg5[%c0_10, %c0_11] : memref<16x4xf32, #tpu.memory_space<vmem>>, vector<16x4xf32>
    %cst = arith.constant dense<0.000000e+00> : vector<16x256xf32>
    %8 = tpu.matmul %7, %1, %cst {dimension_numbers = #tpu.dot_dimension_numbers<[1], [0], [0], [1], [0, 0, 1, 1], [], []>} : vector<16x4xf32>, vector<4x256xf32>, vector<16x256xf32> -> vector<16x256xf32>
    %9 = vector.broadcast %6 : vector<16x1xf32> to vector<16x256xf32>
    %10 = arith.addf %9, %8 : vector<16x256xf32>
    %c0_12 = arith.constant 0 : index
    %c0_13 = arith.constant 0 : index
    %11 = vector.load %arg6[%c0_12, %c0_13] : memref<16x4xf32, #tpu.memory_space<vmem>>, vector<16x4xf32>
    %cst_14 = arith.constant dense<0.000000e+00> : vector<16x256xf32>
    %12 = tpu.matmul %11, %3, %cst_14 {dimension_numbers = #tpu.dot_dimension_numbers<[1], [0], [0], [1], [0, 0, 1, 1], [], []>} : vector<16x4xf32>, vector<4x256xf32>, vector<16x256xf32> -> vector<16x256xf32>
    %13 = arith.addf %10, %12 : vector<16x256xf32>
    %c0_15 = arith.constant 0 : index
    %c0_16 = arith.constant 0 : index
    %14 = vector.load %arg7[%c0_15, %c0_16] : memref<16x8xf32, #tpu.memory_space<vmem>>, vector<16x8xf32>
    %cst_17 = arith.constant dense<0.000000e+00> : vector<16x256xf32>
    %15 = tpu.matmul %14, %5, %cst_17 {dimension_numbers = #tpu.dot_dimension_numbers<[1], [0], [0], [1], [0, 0, 1, 1], [], []>} : vector<16x8xf32>, vector<8x256xf32>, vector<16x256xf32> -> vector<16x256xf32>
    %16 = arith.addf %13, %15 : vector<16x256xf32>
    %17 = arith.negf %16 : vector<16x256xf32>
    %18 = math.exp %17 : vector<16x256xf32>
    %cst_18 = arith.constant 1.000000e+00 : f32
    %19 = vector.broadcast %cst_18 : f32 to vector<16x256xf32>
    %20 = arith.addf %19, %18 : vector<16x256xf32>
    %21 = arith.divf %19, %20 : vector<16x256xf32>
    %c0_19 = arith.constant 0 : index
    %c0_20 = arith.constant 0 : index
    %22 = vector.load %arg12[%c0_19, %c0_20] : memref<32x1xf32, #tpu.memory_space<vmem>>, vector<32x1xf32>
    %23 = vector.extract_strided_slice %21 {offsets = [0, 0], sizes = [4, 256], strides = [1, 1]} : vector<16x256xf32> to vector<4x256xf32>
    %24 = arith.mulf %23, %1 : vector<4x256xf32>
    %c0_21 = arith.constant 0 : index
    %c0_22 = arith.constant 0 : index
    %25 = vector.load %arg9[%c0_21, %c0_22] : memref<32x4xf32, #tpu.memory_space<vmem>>, vector<32x4xf32>
    %cst_23 = arith.constant dense<0.000000e+00> : vector<32x256xf32>
    %26 = tpu.matmul %25, %24, %cst_23 {dimension_numbers = #tpu.dot_dimension_numbers<[1], [0], [0], [1], [0, 0, 1, 1], [], []>} : vector<32x4xf32>, vector<4x256xf32>, vector<32x256xf32> -> vector<32x256xf32>
    %27 = vector.broadcast %22 : vector<32x1xf32> to vector<32x256xf32>
    %28 = arith.addf %27, %26 : vector<32x256xf32>
    %29 = vector.extract_strided_slice %21 {offsets = [4, 0], sizes = [4, 256], strides = [1, 1]} : vector<16x256xf32> to vector<4x256xf32>
    %30 = arith.mulf %29, %3 : vector<4x256xf32>
    %c0_24 = arith.constant 0 : index
    %c0_25 = arith.constant 0 : index
    %31 = vector.load %arg10[%c0_24, %c0_25] : memref<32x4xf32, #tpu.memory_space<vmem>>, vector<32x4xf32>
    %cst_26 = arith.constant dense<0.000000e+00> : vector<32x256xf32>
    %32 = tpu.matmul %31, %30, %cst_26 {dimension_numbers = #tpu.dot_dimension_numbers<[1], [0], [0], [1], [0, 0, 1, 1], [], []>} : vector<32x4xf32>, vector<4x256xf32>, vector<32x256xf32> -> vector<32x256xf32>
    %33 = arith.addf %28, %32 : vector<32x256xf32>
    %34 = vector.extract_strided_slice %21 {offsets = [8, 0], sizes = [8, 256], strides = [1, 1]} : vector<16x256xf32> to vector<8x256xf32>
    %35 = arith.mulf %34, %5 : vector<8x256xf32>
    %c0_27 = arith.constant 0 : index
    %c0_28 = arith.constant 0 : index
    %36 = vector.load %arg11[%c0_27, %c0_28] : memref<32x8xf32, #tpu.memory_space<vmem>>, vector<32x8xf32>
    %cst_29 = arith.constant dense<0.000000e+00> : vector<32x256xf32>
    %37 = tpu.matmul %36, %35, %cst_29 {dimension_numbers = #tpu.dot_dimension_numbers<[1], [0], [0], [1], [0, 0, 1, 1], [], []>} : vector<32x8xf32>, vector<8x256xf32>, vector<32x256xf32> -> vector<32x256xf32>
    %38 = arith.addf %33, %37 : vector<32x256xf32>
    %cst_30 = arith.constant 0.000000e+00 : f32
    %39 = vector.broadcast %cst_30 : f32 to vector<32x256xf32>
    %40 = arith.maximumf %38, %39 : vector<32x256xf32>
    %c0_31 = arith.constant 0 : index
    %c0_32 = arith.constant 0 : index
    %c0_33 = arith.constant 0 : index
    %41 = vector.load %arg13[%c0_31, %c0_32, %c0_33] : memref<1x32x256xf32, #tpu.memory_space<vmem>>, vector<1x32x256xf32>
    %42 = vector.shape_cast %41 : vector<1x32x256xf32> to vector<32x256xf32>
    %43 = vector.shape_cast %40 : vector<32x256xf32> to vector<1x32x256xf32>
    tpu.vector_store %arg13[%c0_31, %c0_32, %c0_33], %43 {strides = array<i32>} : memref<1x32x256xf32, #tpu.memory_space<vmem>>, vector<1x32x256xf32>,
    return
  }
  func.func @transform_0(%arg0: i32, %arg1: i32) -> (i32, i32, i32) {
    %c0_i32 = arith.constant 0 : i32
    %c0_i32_0 = arith.constant 0 : i32
    return %arg0, %c0_i32, %arg1 : i32, i32, i32
  }
  func.func @transform_1(%arg0: i32, %arg1: i32) -> (i32, i32, i32) {
    %c0_i32 = arith.constant 0 : i32
    %c0_i32_0 = arith.constant 0 : i32
    return %arg0, %c0_i32, %arg1 : i32, i32, i32
  }
  func.func @transform_2(%arg0: i32, %arg1: i32) -> (i32, i32, i32) {
    %c0_i32 = arith.constant 0 : i32
    %c0_i32_0 = arith.constant 0 : i32
    return %arg0, %c0_i32, %arg1 : i32, i32, i32
  }
  func.func @transform_3(%arg0: i32, %arg1: i32) -> (i32, i32) {
    %c0_i32 = arith.constant 0 : i32
    %c0_i32_0 = arith.constant 0 : i32
    %c0_i32_1 = arith.constant 0 : i32
    return %c0_i32, %c0_i32_0 : i32, i32
  }
  func.func @transform_4(%arg0: i32, %arg1: i32) -> (i32, i32) {
    %c0_i32 = arith.constant 0 : i32
    %c0_i32_0 = arith.constant 0 : i32
    %c0_i32_1 = arith.constant 0 : i32
    return %c0_i32, %c0_i32_0 : i32, i32
  }
  func.func @transform_5(%arg0: i32, %arg1: i32) -> (i32, i32) {
    %c0_i32 = arith.constant 0 : i32
    %c0_i32_0 = arith.constant 0 : i32
    %c0_i32_1 = arith.constant 0 : i32
    return %c0_i32, %c0_i32_0 : i32, i32
  }
  func.func @transform_6(%arg0: i32, %arg1: i32) -> (i32, i32) {
    %c0_i32 = arith.constant 0 : i32
    %c0_i32_0 = arith.constant 0 : i32
    %c0_i32_1 = arith.constant 0 : i32
    return %c0_i32, %c0_i32_0 : i32, i32
  }
  func.func @transform_7(%arg0: i32, %arg1: i32) -> (i32, i32) {
    %c0_i32 = arith.constant 0 : i32
    %c0_i32_0 = arith.constant 0 : i32
    %c0_i32_1 = arith.constant 0 : i32
    return %c0_i32, %c0_i32_0 : i32, i32
  }
  func.func @transform_8(%arg0: i32, %arg1: i32) -> (i32, i32) {
    %c0_i32 = arith.constant 0 : i32
    %c0_i32_0 = arith.constant 0 : i32
    %c0_i32_1 = arith.constant 0 : i32
    return %c0_i32, %c0_i32_0 : i32, i32
  }
  func.func @transform_9(%arg0: i32, %arg1: i32) -> (i32, i32) {
    %c0_i32 = arith.constant 0 : i32
    %c0_i32_0 = arith.constant 0 : i32
    %c0_i32_1 = arith.constant 0 : i32
    return %c0_i32, %c0_i32_0 : i32, i32
  }
  func.func @transform_10(%arg0: i32, %arg1: i32) -> (i32, i32) {
    %c0_i32 = arith.constant 0 : i32
    %c0_i32_0 = arith.constant 0 : i32
    %c0_i32_1 = arith.constant 0 : i32
    return %c0_i32, %c0_i32_0 : i32, i32
  }
  func.func @transform_11(%arg0: i32, %arg1: i32) -> (i32, i32, i32) {
    %c0_i32 = arith.constant 0 : i32
    %c0_i32_0 = arith.constant 0 : i32
    return %arg0, %c0_i32, %arg1 : i32, i32, i32
  }
}

</mosaic_0001>

<bundles_post_ra>
// kernel: tpu_custom_call.1
= control target key start
LH: loop header
LB: loop body
LE: loop exit
PB: predicated region body
PF: predicated region fallthrough
CT: control target
= control target key end

     0   :  { %16 = vsyncpa [#allocation3], 0  ;;  %s1779_s0 = inlined_call_operand.vmem [shape: f32[2,4,256], index: 0, kind: input, shape index: {}]   ;;  %s1780_s1 = inlined_call_operand.vmem [shape: f32[2,4,256], index: 1, kind: input, shape index: {}]   ;;  %s1781_s2 = inlined_call_operand.vmem [shape: f32[2,8,256], index: 2, kind: input, shape index: {}]   ;;  %s1782_s3 = inlined_call_operand.vmem [shape: f32[16,4], index: 3, kind: input, shape index: {}]   ;;  %s1783_s4 = inlined_call_operand.vmem [shape: f32[16,4], index: 4, kind: input, shape index: {}]   ;;  %s1784_s5 = inlined_call_operand.vmem [shape: f32[16,8], index: 5, kind: input, shape index: {}]   ;;  %s1785_s6 = inlined_call_operand.vmem [shape: f32[16,1], index: 6, kind: input, shape index: {}]   ;;  %s1786_s7 = inlined_call_operand.vmem [shape: f32[32,4], index: 7, kind: input, shape index: {}]   ;;  %s1787_s8 = inlined_call_operand.vmem [shape: f32[32,4], index: 8, kind: input, shape index: {}]   ;;  %s1788_s9 = inlined_call_operand.vmem [shape: f32[32,8], index: 9, kind: input, shape index: {}]   ;;  %s1789_s10 = inlined_call_operand.vmem [shape: f32[32,1], index: 10, kind: input, shape index: {}]   ;;  %s1790_s11 = inlined_call_operand.hbm [shape: f32[2,32,256], index: 11, kind: output, shape index: {}]  }
   0x1   :  { %18 = vsyncpa [#allocation3 + $0x1], 0  ;;  %s1514_s17 = smov 0   ;;  %s1516_s18 = smov 0  }
   0x2   :  { %s1518_s19 = smov 0   ;;  %s1520_s20 = smov 0  }
   0x3   :  { %s1522_s21 = smov 0   ;;  %s1524_s22 = smov 0  }
   0x4 LB: > { %1793 = sst [smem:[#allocation5_spill]] %s1445_s21  ;;  %s1223_s23 = sadd.s32 4294967295, %s1449_s22   ;;  %s1449_s22 = sphi %s1524_s22, %s24_s22   ;;  %s1445_s21 = sphi %s1522_s21, %s1800_s21   ;;  %s1441_s20 = sphi %s1520_s20, %s1799_s20   ;;  %s1437_s19 = sphi %s1518_s19, %s1803_s19   ;;  %s1433_s18 = sphi %s1516_s18, %s1802_s18   ;;  %s1429_s17 = sphi %s1514_s17, %s1801_s17  }
   0x5   : > { %s1224_s24 = sadd.s32 4294967294, %s1449_s22   ;;  %s36_s25 = sadd.s32 1, %s1445_s21 }
   0x6   : > { %s297_s26 = sadd.s32 1, %s1437_s19  ;;  %p38_p0 = scmp.ge.s32.totalorder %s36_s25, 2 }
   0x7   : > { %p307_p1 = scmp.ne.s32.totalorder %s1437_s19, %s1433_s18  ;;  %p308_p2 = scmp.eq.s32.totalorder %s1223_s23, 1 }
   0x8   : > { %p313_p3 = scmp.ne.s32.totalorder %s1433_s18, %s1429_s17  ;;  %s1805_s25 = smov (%p38_p0, %s36_s25), 0 }
   0x9   : > { %1794 = sst [smem:[#allocation6_spill]] %s1805_s25  ;;  %p1554_p4 = por %p308_p2, %p307_p1 }
   0xa   : > { %p314_p5 = scmp.eq.s32.totalorder %s1224_s24, 1  ;;  %s292_s28 = ssub.s32 %s1445_s21, %s1805_s25 }
   0xb   : > { %p1227_p6 = scmp.ge.s32.totalorder %s1449_s22, 1  ;;  %p295_p7 = scmp.eq.s32.totalorder %s292_s28, 0 }
   0xc   : > { %p1561_p8 = por %p314_p5, %p313_p3  ;;  %p395_p9 = scmp.lt.s32.totalorder %s1449_s22, 3 }
   0xd   : > { %s1567_s30 = scalar_select %p295_p7, %s1437_s19, %s297_s26  }
   0xe   : > { %p396_p10 = pnand %p1227_p6, %p395_p9 }
   0xf   : > { %1797 = sst [smem:[#allocation7_spill]] %s1567_s30  ;;  %p458_p11 = scmp.lt.s32.totalorder (!%p396_p10), %s1441_s20, 1 }
  0x10   : > { %399 = sbr.rel (%p396_p10) target bundleno = 416 (0x1a0), region = 64  ;;  %s454_s12 = sand.u32 (!%p396_p10), 1, %s1433_s18  }
  0x15   : > { %v492_v0 = vld [vmem:[%s1785_s6] sm:$0xff]  ;;  %s459_s14 = scalar_select %p458_p11, %s1441_s20, 1  ;;  %v1451_v1 = vmov 0   ;;  %v493_v3 = vld [vmem:[%s1785_s6 + $0x8] sm:$0xff]  ;;  %vm507_vm0 = vcmask 1043456   ;;  %vm500_vm1 = vcmask 31744  }
  0x16   : > { %1352 = vset.pattern.permute.xlu0 %v1451_v1  ;;  %1353 = vset.pattern.permute.xlu1 %v1451_v1  ;;  %v494_v5 = vld [vmem:[%s1782_s3] sm:$0xff]  ;;  %v495_v8 = vld [vmem:[%s1782_s3 + $0x8] sm:$0xff]  ;;  %vm640_vm2 = vcmask 64512  }
  0x17   : > { %560 = vperm.xlu0 %1352, %v492_v0   ;;  %1354 = vset.pattern.permute.xlu2 %v1451_v1  ;;  %s1288_s15 = sshll.u32 %s459_s14, 3  ;;  %s1290_s25 = sshll.u32 %s459_s14, 4  ;;  %v573_v11 = vld [vmem:[%s1783_s4 + $0x8] sm:$0xff]  ;;  %v572_v14 = vld [vmem:[%s1783_s4] sm:$0xff] }
  0x18   : > { %s465_s24 = scalar_lea.vmem %s1779_s0, %s1288_s15  ;;  %s475_s13 = scalar_lea.vmem %s1780_s1, %s1288_s15  ;;  %v638_v15 = vld [vmem:[%s1784_s5] sm:$0xff]  ;;  %v639_v16 = vld [vmem:[%s1784_s5 + $0x8] sm:$0xff] }
  0x19   : > { %v488_v2 = vld [vmem:[%s465_s24] sm:$0xff]  ;;  %s485_s30 = scalar_lea.vmem %s1781_s2, %s1290_s25  ;;  %s1291_s15 = sshll.u32 %s1441_s20, 6 }
  0x1a   : > { %497 = vst [vmem:[#allocation1] ss:$2 sm:$0xff] %v488_v2  ;;  %v489_v4 = vld [vmem:[%s475_s13] sm:$0xff]  ;;  %v1605_v13 = vld [vmem:[%s485_s30 + $0x8] sm:$0xff]  ;;  %s1228_s13 = sshll.u32 %s454_s12, 6  ;;  %s1104_s21 = scalar_lea.hbm %s1790_s11, %s1291_s15 }
  0x1b   : > { %v1603_v12 = vld [vmem:[%s485_s30] sm:$0xff]  ;;  %s1730_s25 = scalar_lea.vmem [#allocation2], %s1228_s13  ;;  %s1107_s20 = sshll.u32 %s1104_s21, 4  ;;  %s1108_s20 = int_to_ptr.hbm [resolvable:$true] %s1107_s20 }
  0x1c   : > { %v773_v54 = vld [vmem:[%s1789_s10] sm:$0xff]  ;;  %s1105_s30 = sshll.u32 %s1730_s25, 4  ;;  %s1091_s24 = scalar_lea.sflag [#allocation3], %s454_s12  ;;  %s1106_s30 = int_to_ptr.vmem [resolvable:$true] %s1105_s30 }
  0x1d   : > { %866 = vperm.xlu1 %1353, %v773_v54   ;;  %v992_v54 = vld [vmem:[%s1788_s9] sm:$0xff]  ;;  %s1385_s26 = sshra.s32 %s1108_s20, 4  ;;  %s1391_s15 = scalar_lea.hbm %s1790_s11, 128  ;;  %s1386_s26 = int_to_ptr.hbm [resolvable:$true] %s1385_s26 }
  0x1e   : > { %s1387_s14 = scalar_lea.hbm %s1386_s26, 64  ;;  %p1392_p1 = scmp.lt.s32.totalorder %s1386_s26, %s1790_s11 }
  0x1f   : > { %565 = vperm.xlu0 %1352, %v493_v3   ;;  %p1388_p12 = scmp.ne.s32.totalorder %s1386_s26, %s1387_s14  ;;  %p1393_p2 = scmp.lt.s32.totalorder %s1391_s15, %s1387_s14 }
  0x21   : > { %v498_v6 = vld.sshfl [vmem:[#allocation1] sm:$0xff pattern:$0x75316420]  ;;  %v499_v7 = vld.sshfl [vmem:[#allocation1 + $0x8] sm:$0xff pattern:$0x75316420]  ;;  %p1389_p13 = pnand %p1388_p12, %p1554_p4  ;;  %p1394_p3 = por %p1393_p2, %p1392_p1 }
  0x22   : > { %1235 = vmatpush.msk.msra.mxu0 %vm507_vm0, %v498_v6  ;;  %1238 = vmatpush.msk.msra.mxu1 %vm507_vm0, %v499_v7  ;;  %575 = vst [vmem:[#allocation1] ss:$2 sm:$0xff] %v489_v4  ;;  %v774_v7 = vld [vmem:[%s1789_s10 + $0x8] sm:$0xff] }
  0x23   : > { %1236 = vmatmul.msk.f32.vlgmr.msra.gmra.mxu0 %vm500_vm1, %v494_v5  ;;  %1239 = vmatmul.msk.f32.vlgmr.msra.gmra.mxu1 %vm500_vm1, %v494_v5  ;;  %p1390_p0 = pneg %p1389_p13 }
  0x25   : > { %871 = vperm.xlu1 %1353, %v774_v7   ;;  %p1395_p5 = pnand %p1394_p3, %p1390_p0 }
  0x29   : > { %v576_v9 = vld.sshfl [vmem:[#allocation1] sm:$0xff pattern:$0x75316420]  ;;  %v577_v10 = vld.sshfl [vmem:[#allocation1 + $0x8] sm:$0xff pattern:$0x75316420] }
  0x2a   : > { %1241 = vmatpush.msk.msrb.mxu0 %vm507_vm0, %v576_v9  ;;  %1292 = vmatpush.msk.msra.mxu2 %vm507_vm0, %v576_v9  ;;  %777 = vst [vmem:[#allocation1] ss:$2 sm:$0xff] %v488_v2 }
  0x2b   : > { %1244 = vmatpush.msk.msrb.mxu1 %vm507_vm0, %v577_v10  ;;  %1293 = vmatpush.msk.msra.mxu3 %vm507_vm0, %v577_v10 }
  0x2c   : > { %1237 = vmatmul.msk.f32.gmra.mxu0 %vm500_vm1, %v495_v8  ;;  %1240 = vmatmul.msk.f32.gmra.mxu1 %vm500_vm1, %v495_v8 }
  0x2d   : > { %1243 = vmatmul.msk.f32.vlgmr.msra.gmra.mxu2 %vm500_vm1, %v573_v11  ;;  %1246 = vmatmul.msk.f32.vlgmr.msra.gmra.mxu3 %vm500_vm1, %v573_v11 }
  0x2e   : > { %662 = vmatpush.msra.mxu0 %v1603_v12  ;;  %685 = vmatpush.msra.mxu1 %v1605_v13 }
  0x31   : > { %v1628_v24 = vld.sshfl [vmem:[#allocation1] sm:$0xff pattern:$0x75316420]  ;;  %v1630_v25 = vld.sshfl [vmem:[#allocation1 + $0x8] sm:$0xff pattern:$0x75316420] }
  0x32   : > { %893 = vst [vmem:[#allocation1 + $0x1] ss:$2 sm:$0xff] %v489_v4 }
  0x34   : > { %1242 = vmatmul.msk.f32.vlgmr.msrb.gmra.mxu0 %vm500_vm1, %v572_v14  ;;  %1245 = vmatmul.msk.f32.vlgmr.msrb.gmra.mxu1 %vm500_vm1, %v572_v14 }
  0x39   : > { %v894_v11 = vld.sshfl [vmem:[#allocation1] sm:$0xff pattern:$0x75316420] }
  0x3c   : > { %1247 = vmatmul.msk.f32.vlgmr.msra.gmra.mxu0 %vm640_vm2, %v638_v15  ;;  %1249 = vmatmul.msk.f32.vlgmr.msra.gmra.mxu1 %vm640_vm2, %v638_v15 }
  0x44   : > { %1248 = vmatmul.msk.f32.gmra.mxu0 %vm640_vm2, %v639_v16  ;;  %1250 = vmatmul.msk.f32.gmra.mxu1 %vm640_vm2, %v639_v16 }
  0x89   : > { %v561_v21 = vpop.permute.xlu0 %560 }
  0x91   : > { %v566_v34 = vpop.permute.xlu0 %565 }
  0xa0   : > { %v529_v17 = vpop.f32.mrf.mxu0  ;;  %v552_v18 = vpop.f32.mrf.mxu1 }
  0xa1   : > { %v568_v26 = vadd.f32 %v561_v21, %v529_v17  ;;  %v569_v27 = vadd.f32 %v561_v21, %v552_v18  ;;  %v895_v17 = vld.sshfl [vmem:[#allocation1 + $0x8] sm:$0xff pattern:$0x75316420] }
  0xa9   : > { %v532_v19 = vpop.f32.mrf.mxu0  ;;  %v555_v20 = vpop.f32.mrf.mxu1 }
  0xaa   : > { %v570_v39 = vadd.f32 %v566_v34, %v532_v19  ;;  %v571_v40 = vadd.f32 %v566_v34, %v555_v20  ;;  %v900_v34 = vld [vmem:[%s1787_s8] sm:$0xff] }
  0xb0   : > { %v608_v37 = vpop.f32.mrf.mxu2  ;;  %v631_v38 = vpop.f32.mrf.mxu3 }
  0xb1   : > { %v605_v22 = vpop.f32.mrf.mxu0  ;;  %v628_v23 = vpop.f32.mrf.mxu1  ;;  %v636_v41 = vadd.f32 %v608_v37, %v570_v39  ;;  %v637_v42 = vadd.f32 %v631_v38, %v571_v40 }
  0xb2   : > { %v634_v28 = vadd.f32 %v605_v22, %v568_v26  ;;  %v635_v29 = vadd.f32 %v628_v23, %v569_v27  ;;  %v784_v26 = vld [vmem:[%s1786_s7] sm:$0xff] }
  0xb9   : > { %v664_v30 = vpop.f32.mrf.mxu0  ;;  %v687_v31 = vpop.f32.mrf.mxu1 }
  0xba   : > { %v693_v32 = vadd.f32 %v664_v30, %v634_v28  ;;  %v694_v33 = vadd.f32 %v687_v31, %v635_v29 }
  0xbc   : > { %v1251_v35 = vmul.f32 -1.442695, %v693_v32  ;;  %v1252_v36 = vmul.f32 -1.442695, %v694_v33 }
  0xbe   : > { %1355 = vpow2.f32 %v1251_v35 }
  0xbf   : > { %1357 = vpow2.f32 %v1252_v36 }
  0xc1   : > { %v667_v43 = vpop.f32.mrf.mxu0  ;;  %v690_v44 = vpop.f32.mrf.mxu1 }
  0xc2   : > { %v695_v45 = vadd.f32 %v667_v43, %v636_v41  ;;  %v696_v46 = vadd.f32 %v690_v44, %v637_v42 }
  0xc4   : > { %v1356_v47 = vpop.eup %1355  ;;  %v1253_v48 = vmul.f32 -1.442695, %v695_v45  ;;  %v1254_v51 = vmul.f32 -1.442695, %v696_v46  ;;  %v785_v46 = vld [vmem:[%s1786_s7 + $0x8] sm:$0xff] }
  0xc5   : > { %v1358_v49 = vpop.eup %1357  ;;  %v709_v50 = vadd.f32 1.0, %v1356_v47 }
  0xc6   : > { %v710_v52 = vadd.f32 1.0, %v1358_v49  ;;  %1359 = vpow2.f32 %v1253_v48  ;;  %v901_v49 = vld [vmem:[%s1787_s8 + $0x8] sm:$0xff] }
  0xc7   : > { %1361 = vrcp.f32 %v709_v50  ;;  %v722_v63 = vand.u32 2147483647, %v709_v50  ;;  %v724_v0 = vand.u32 2147483648, %v709_v50  ;;  %vm718_vm5 = vweird.f32 %v709_v50 }
  0xc8   : > { %1363 = vrcp.f32 %v710_v52  ;;  %v739_v3 = vand.u32 2147483648, %v710_v52  ;;  %v737_v5 = vand.u32 2147483647, %v710_v52  ;;  %vm733_vm7 = vweird.f32 %v710_v52 }
  0xc9   : > { %1365 = vpow2.f32 %v1254_v51  ;;  %v725_v9 = vor.u32 1.1754944e-38, %v724_v0  ;;  %vm723_vm8 = vcmp.eq.f32.partialorder %v722_v63, 8.507059e+37  ;;  %v902_v51 = vld [vmem:[%s1787_s8 + $0x10] sm:$0xff] }
  0xca   : > { %v740_v16 = vor.u32 1.1754944e-38, %v739_v3  ;;  %vm738_vm10 = vcmp.eq.f32.partialorder %v737_v5, 8.507059e+37 }
  0xcc   : > { %v1360_v53 = vpop.eup %1359 }
  0xcd   : > { %v1362_v55 = vpop.eup %1361  ;;  %v1635_v56 = vadd.f32 1.0, %v1360_v53  ;;  %v775_v53 = vld [vmem:[%s1789_s10 + $0x10] sm:$0xff] }
  0xce   : > { %v1364_v57 = vpop.eup %1363  ;;  %v714_v58 = vmul.f32 %v1362_v55, %v709_v50  ;;  %vm719_vm3 = vweird.f32 %v1362_v55  ;;  %876 = vperm.xlu2 %1354, %v775_v53  }
  0xcf   : > { %v1366_v59 = vpop.eup %1365  ;;  %v729_v60 = vmul.f32 %v1364_v57, %v710_v52  ;;  %1367 = vrcp.f32 %v1635_v56  ;;  %vm734_vm4 = vweird.f32 %v1364_v57  ;;  %vm720_vm6 = vmor %vm718_vm5, %vm719_vm3  ;;  %v754_v31 = vand.u32 2147483648, %v1635_v56  ;;  %v903_v52 = vld [vmem:[%s1787_s8 + $0x18] sm:$0xff] }
  0xd0   : > { %v1638_v61 = vadd.f32 1.0, %v1366_v59  ;;  %v715_v62 = vsub.f32 1.0, %v714_v58  ;;  %vm735_vm9 = vmor %vm733_vm7, %vm734_vm4  ;;  %vm748_vm12 = vweird.f32 %v1635_v56  ;;  %v995_v58 = vld [vmem:[%s1788_s9 + $0x18] sm:$0xff] }
  0xd1   : > { %v730_v1 = vsub.f32 1.0, %v729_v60  ;;  %v755_v38 = vor.u32 1.1754944e-38, %v754_v31 }
  0xd2   : > { %1369 = vrcp.f32 %v1638_v61  ;;  %v716_v2 = vmul.f32 %v1362_v55, %v715_v62  ;;  %v769_v37 = vand.u32 2147483648, %v1638_v61  ;;  %v767_v40 = vand.u32 2147483647, %v1638_v61 }
  0xd3   : > { %v731_v4 = vmul.f32 %v1364_v57, %v730_v1  ;;  %vm763_vm3 = vweird.f32 %v1638_v61  ;;  %v867_v1 = vpop.permute.xlu1 %866 }
  0xd4   : > { %v717_v6 = vadd.f32 %v1362_v55, %v716_v2  ;;  %v770_v45 = vor.u32 1.1754944e-38, %v769_v37 }
  0xd5   : > { %v1368_v8 = vpop.eup %1367  ;;  %v732_v10 = vadd.f32 %v1364_v57, %v731_v4 }
  0xd6   : > { %v744_v14 = vmul.f32 %v1368_v8, %v1635_v56  ;;  %v721_v15 = vsel %vm720_vm6, %v1362_v55, %v717_v6  ;;  %vm749_vm11 = vweird.f32 %v1368_v8  ;;  %v776_v55 = vld [vmem:[%s1789_s10 + $0x18] sm:$0xff] }
  0xd7   : > { %v726_v18 = vsel %vm723_vm8, %v725_v9, %v721_v15  ;;  %v736_v19 = vsel %vm735_vm9, %v1364_v57, %v732_v10  ;;  %vm750_vm13 = vmor %vm748_vm12, %vm749_vm11  ;;  %881 = vperm.xlu2 %1354, %v776_v55   ;;  %v994_v57 = vld [vmem:[%s1788_s9 + $0x10] sm:$0xff] }
  0xd8   : > { %v1370_v20 = vpop.eup %1369  ;;  %v745_v21 = vsub.f32 1.0, %v744_v14  ;;  %v782_v22 = vmul.f32 %v1628_v24, %v726_v18  ;;  %v741_v23 = vsel %vm738_vm10, %v740_v16, %v736_v19  ;;  %v898_v27 = vmul.f32 %v894_v11, %v726_v18 }
  0xd9   : > { %v759_v28 = vmul.f32 %v1370_v20, %v1638_v61  ;;  %v783_v29 = vmul.f32 %v1630_v25, %v741_v23  ;;  %v899_v30 = vmul.f32 %v895_v17, %v741_v23  ;;  %v752_v24 = vand.u32 2147483647, %v1635_v56  ;;  %v993_v56 = vld [vmem:[%s1788_s9 + $0x8] sm:$0xff] }
  0xda   : > { %1255 = vmatpush.msk.msrb.mxu2 %vm507_vm0, %v782_v22  ;;  %v906_v32 = vrot.slane %v898_v27, 4  ;;  %v746_v33 = vmul.f32 %v1368_v8, %v745_v21  ;;  %vm764_vm14 = vweird.f32 %v1370_v20 }
  0xdb   : > { %v760_v35 = vsub.f32 1.0, %v759_v28  ;;  %1260 = vmatpush.msk.msrb.mxu3 %vm507_vm0, %v783_v29  ;;  %v907_v36 = vrot.slane %v899_v30, 4  ;;  %1256 = vmatmul.msk.f32.vlgmr.msrb.gmra.mxu2 %vm500_vm1, %v784_v26  ;;  %vm753_vm15 = vcmp.eq.f32.partialorder %v752_v24, 8.507059e+37  ;;  %vm765_vm4 = vmor %vm763_vm3, %vm764_vm14  ;;  %v872_v9 = vpop.permute.xlu1 %871 }
  0xdc   : > { %1261 = vmatmul.msk.f32.vlgmr.msrb.gmra.mxu3 %vm500_vm1, %v784_v26  ;;  %1265 = vmatpush.msk.msrb.mxu0 %vm507_vm0, %v906_v32  ;;  %v747_v25 = vadd.f32 %v1368_v8, %v746_v33 }
  0xdd   : > { %1270 = vmatpush.msk.msrb.mxu1 %vm507_vm0, %v907_v36  ;;  %v761_v39 = vmul.f32 %v1370_v20, %v760_v35  ;;  %1266 = vmatmul.msk.f32.vlgmr.msrb.gmra.mxu0 %vm500_vm1, %v900_v34  ;;  %vm768_vm0 = vcmp.eq.f32.partialorder %v767_v40, 8.507059e+37 }
  0xde   : > { %v751_v41 = vsel %vm750_vm13, %v1368_v8, %v747_v25  ;;  %1271 = vmatmul.msk.f32.vlgmr.msrb.gmra.mxu1 %vm500_vm1, %v900_v34 }
  0xdf   : > { %v756_v42 = vsel %vm753_vm15, %v755_v38, %v751_v41  ;;  %v762_v43 = vadd.f32 %v1370_v20, %v761_v39 }
  0xe0   : > { %v990_v44 = vmul.f32 %v756_v42, %v1603_v12  ;;  %v786_v12 = vld [vmem:[%s1786_s7 + $0x10] sm:$0xff] }
  0xe1   : > { %v766_v47 = vsel %vm765_vm4, %v1370_v20, %v762_v43 }
  0xe2   : > { %1023 = vmatpush.msra.mxu2 %v990_v44  ;;  %v771_v48 = vsel %vm768_vm0, %v770_v45, %v766_v47 }
  0xe3   : > { %v991_v50 = vmul.f32 %v771_v48, %v1605_v13  ;;  %1257 = vmatmul.msk.f32.gmra.mxu2 %vm500_vm1, %v785_v46  ;;  %v787_v13 = vld [vmem:[%s1786_s7 + $0x18] sm:$0xff] }
  0xe4   : > { %1262 = vmatmul.msk.f32.gmra.mxu3 %vm500_vm1, %v785_v46 }
  0xe5   : > { %1052 = vmatpush.msra.mxu3 %v991_v50  ;;  %1267 = vmatmul.msk.f32.gmra.mxu0 %vm500_vm1, %v901_v49 }
  0xe6   : > { %1272 = vmatmul.msk.f32.gmra.mxu1 %vm500_vm1, %v901_v49 }
  0xeb   : > { %1258 = vmatmul.msk.f32.gmra.mxu2 %vm500_vm1, %v786_v12 }
  0xec   : > { %1263 = vmatmul.msk.f32.gmra.mxu3 %vm500_vm1, %v786_v12 }
  0xed   : > { %1268 = vmatmul.msk.f32.gmra.mxu0 %vm500_vm1, %v902_v51 }
  0xee   : > { %1273 = vmatmul.msk.f32.gmra.mxu1 %vm500_vm1, %v902_v51 }
  0xf3   : > { %1259 = vmatmul.msk.f32.gmra.mxu2 %vm500_vm1, %v787_v13 }
  0xf4   : > { %1264 = vmatmul.msk.f32.gmra.mxu3 %vm500_vm1, %v787_v13 }
  0xf5   : > { %1269 = vmatmul.msk.f32.gmra.mxu0 %vm500_vm1, %v903_v52 }
  0xf6   : > { %1274 = vmatmul.msk.f32.gmra.mxu1 %vm500_vm1, %v903_v52 }
  0xfb   : > { %1275 = vmatmul.msk.f32.vlgmr.msra.gmra.mxu2 %vm640_vm2, %v992_v54 }
  0xfc   : > { %1279 = vmatmul.msk.f32.vlgmr.msra.gmra.mxu3 %vm640_vm2, %v992_v54 }
 0x103   : > { %1276 = vmatmul.msk.f32.gmra.mxu2 %vm640_vm2, %v993_v56 }
 0x104   : > { %1280 = vmatmul.msk.f32.gmra.mxu3 %vm640_vm2, %v993_v56 }
 0x10b   : > { %1277 = vmatmul.msk.f32.gmra.mxu2 %vm640_vm2, %v994_v57 }
 0x10c   : > { %1281 = vmatmul.msk.f32.gmra.mxu3 %vm640_vm2, %v994_v57 }
 0x113   : > { %1278 = vmatmul.msk.f32.gmra.mxu2 %vm640_vm2, %v995_v58 }
 0x114   : > { %1282 = vmatmul.msk.f32.gmra.mxu3 %vm640_vm2, %v995_v58 }
 0x128   : > { %v877_v23 = vpop.permute.xlu2 %876 }
 0x131   : > { %v882_v38 = vpop.permute.xlu2 %881 }
 0x15a   : > { %v941_v2 = vpop.f32.mrf.mxu0 }
 0x15b   : > { %v970_v3 = vpop.f32.mrf.mxu1 }
 0x15e   : > { %v823_v59 = vpop.f32.mrf.mxu2 }
 0x15f   : > { %v852_v60 = vpop.f32.mrf.mxu3  ;;  %v884_v6 = vadd.f32 %v867_v1, %v823_v59 }
 0x160   : > { %v885_v7 = vadd.f32 %v867_v1, %v852_v60 }
 0x161   : > { %v982_v8 = vadd.f32 %v941_v2, %v884_v6 }
 0x162   : > { %v983_v10 = vadd.f32 %v970_v3, %v885_v7  ;;  %v944_v11 = vpop.f32.mrf.mxu0 }
 0x163   : > { %v973_v15 = vpop.f32.mrf.mxu1 }
 0x166   : > { %v826_v61 = vpop.f32.mrf.mxu2 }
 0x167   : > { %v855_v62 = vpop.f32.mrf.mxu3  ;;  %v886_v19 = vadd.f32 %v872_v9, %v826_v61 }
 0x168   : > { %v887_v21 = vadd.f32 %v872_v9, %v855_v62 }
 0x169   : > { %v984_v26 = vadd.f32 %v944_v11, %v886_v19 }
 0x16a   : > { %v985_v27 = vadd.f32 %v973_v15, %v887_v21  ;;  %v947_v31 = vpop.f32.mrf.mxu0 }
 0x16b   : > { %v976_v24 = vpop.f32.mrf.mxu1 }
 0x16e   : > { %v829_v63 = vpop.f32.mrf.mxu2 }
 0x16f   : > { %v858_v0 = vpop.f32.mrf.mxu3  ;;  %v888_v33 = vadd.f32 %v877_v23, %v829_v63 }
 0x170   : > { %v889_v35 = vadd.f32 %v877_v23, %v858_v0 }
 0x171   : > { %v986_v25 = vadd.f32 %v947_v31, %v888_v33 }
 0x172   : > { %v987_v37 = vadd.f32 %v976_v24, %v889_v35  ;;  %v950_v46 = vpop.f32.mrf.mxu0 }
 0x173   : > { %v979_v48 = vpop.f32.mrf.mxu1 }
 0x176   : > { %v832_v4 = vpop.f32.mrf.mxu2 }
 0x177   : > { %v861_v5 = vpop.f32.mrf.mxu3  ;;  %v890_v43 = vadd.f32 %v882_v38, %v832_v4 }
 0x178   : > { %v891_v45 = vadd.f32 %v882_v38, %v861_v5 }
 0x179   : > { %v988_v49 = vadd.f32 %v950_v46, %v890_v43 }
 0x17a   : > { %v989_v50 = vadd.f32 %v979_v48, %v891_v45 }
 0x17e   : > { %v1025_v14 = vpop.f32.mrf.mxu2 }
 0x17f   : > { %v1066_v16 = vadd.f32 %v1025_v14, %v982_v8  ;;  %v1054_v17 = vpop.f32.mrf.mxu3 }
 0x180   : > { %v1067_v18 = vadd.f32 %v1054_v17, %v983_v10 }
 0x181   : > { %v1074_v20 = vmax.f32 %v1066_v16, 0.0 }
 0x182   : > { %v1075_v22 = vmax.f32 %v1067_v18, 0.0 }
 0x183   : > { %1082 = vst [vmem:[%s1730_s25] sm:$0xff] %v1074_v20 }
 0x184   : > { %1083 = vst [vmem:[%s1730_s25 + $0x8] sm:$0xff] %v1075_v22 }
 0x186   : > { %v1028_v28 = vpop.f32.mrf.mxu2 }
 0x187   : > { %v1068_v29 = vadd.f32 %v1028_v28, %v984_v26  ;;  %v1057_v30 = vpop.f32.mrf.mxu3 }
 0x188   : > { %v1069_v32 = vadd.f32 %v1057_v30, %v985_v27 }
 0x189   : > { %v1076_v34 = vmax.f32 %v1068_v29, 0.0 }
 0x18a   : > { %v1077_v36 = vmax.f32 %v1069_v32, 0.0 }
 0x18b   : > { %1084 = vst [vmem:[%s1730_s25 + $0x10] sm:$0xff] %v1076_v34 }
 0x18c   : > { %1085 = vst [vmem:[%s1730_s25 + $0x18] sm:$0xff] %v1077_v36 }
 0x18e   : > { %v1031_v39 = vpop.f32.mrf.mxu2 }
 0x18f   : > { %v1070_v40 = vadd.f32 %v1031_v39, %v986_v25  ;;  %v1060_v41 = vpop.f32.mrf.mxu3 }
 0x190   : > { %v1071_v42 = vadd.f32 %v1060_v41, %v987_v37 }
 0x191   : > { %v1078_v44 = vmax.f32 %v1070_v40, 0.0 }
 0x192   : > { %v1079_v47 = vmax.f32 %v1071_v42, 0.0 }
 0x193   : > { %1086 = vst [vmem:[%s1730_s25 + $0x20] sm:$0xff] %v1078_v44 }
 0x194   : > { %1087 = vst [vmem:[%s1730_s25 + $0x28] sm:$0xff] %v1079_v47 }
 0x196   : > { %v1034_v12 = vpop.f32.mrf.mxu2 }
 0x197   : > { %v1072_v51 = vadd.f32 %v1034_v12, %v988_v49  ;;  %v1063_v13 = vpop.f32.mrf.mxu3 }
 0x198   : > { %v1073_v52 = vadd.f32 %v1063_v13, %v989_v50 }
 0x199   : > { %v1080_v53 = vmax.f32 %v1072_v51, 0.0 }
 0x19a   : > { %v1081_v54 = vmax.f32 %v1073_v52, 0.0 }
 0x19b   : > { %1088 = vst [vmem:[%s1730_s25 + $0x30] sm:$0xff] %v1080_v53 }
 0x19c   : > { %1089 = vst [vmem:[%s1730_s25 + $0x38] sm:$0xff] %v1081_v54 }
 0x19d   : > { %1398 = shalt.err (!%p1395_p5)
}
 0x19e   : > { %s1452_s12 = smov 256   ;;  %s1453_s25 = smov 16  }
 0x19f   : > { %1294 = dma.vmem_to_hbm [thread:$0]  (%p1554_p4), %s1106_s30, 1024, %s1108_s20, %s1091_s24, %s1452_s12, %s1452_s12, %s1453_s25  }
 0x1a0 PF: > { %p1300_p6 = scmp.ge.s32.totalorder %s1449_s22, 2  ;;  %s1122_s21 = sand.u32 1, %s1429_s17  }
 0x1a1   : > { %s1123_s28 = scalar_lea.sflag [#allocation3], %s1122_s21 }
 0x1a2   : > { %p1297_p7 = pnand %p1300_p6, %p1561_p8 }
 0x1a4   : > { %p1298_p9 = pneg %p1297_p7 }
 0x1a6   : > { %1424 = dma.done.wait (%p1298_p9), %s1123_s28, 1024  }
 0x1a7   : > { %1426 = vsyncadd (%p1298_p9), %s1123_s28, 4294966272  ;;  %s24_s22 = sadd.s32 1, %s1449_s22   ;;  %s1798_s26 = sld [smem:[#allocation7_spill]] }
 0x1a8   : > { %p21_p10 = scmp.ge.s32.totalorder %s24_s22, 4   ;;  %s1799_s20 = sld [smem:[#allocation5_spill]] }
 0x1a9   : > { %s1800_s21 = sld [smem:[#allocation6_spill]]  ;;  %s1801_s17 = smov %s1433_s18 }
 0x1aa   : > { %s1802_s18 = smov %s1437_s19  ;;  %23 = sbr.rel (!%p21_p10) target bundleno = 4 (0x4), region = 106 }
 0x1ad   : > { %s1803_s19 = smov %s1798_s26 }
 0x1af   :  { %1129 = vsyncpa [#allocation3], 1 }
 0x1b0   :  { %1131 = vsyncpa [#allocation3 + $0x1], 1 }

</bundles_post_ra>
